<compile_context>
chip_gen: v7x
topology: tpu7x:2x2x1
jax: 0.10.0
libtpu: 0.0.40
codegen_flags: <defaults>
</compile_context>

<pallas_src>
import functools
import math
import random

import numpy as np

import jax
import jax.numpy as jnp
from jax.experimental import pallas as pl
from jax.experimental.pallas import tpu as pltpu


def _round_up(x: int, m: int) -> int:
    return ((x + m - 1) // m) * m


def _bilinear_matrix(out_size: int, in_size: int) -> np.ndarray:
    """(out_size, in_size) matrix M so that M @ x bilinearly resizes axis 0 of x
    from in_size to out_size (half-pixel centers / align_corners=False)."""
    m = np.zeros((out_size, in_size), dtype=np.float32)
    if in_size == 1:
        m[:, 0] = 1.0
        return m
    scale = in_size / out_size
    for o in range(out_size):
        src = max((o + 0.5) * scale - 0.5, 0.0)
        i0 = min(int(math.floor(src)), in_size - 1)
        i1 = min(i0 + 1, in_size - 1)
        frac = src - i0
        m[o, i0] += 1.0 - frac
        m[o, i1] += frac
    return m


def _make_resize_kernel(c: int, wi_p: int):
    def kernel(x_ref, r_ref, cm_ref, o_ref):
        # Row interpolation: one big MXU matmul, channels folded into N.
        #   (tile_ho, hi_p) @ (hi_p, C*wi_p) -> (tile_ho, C*wi_p), f32 accumulate.
        mid = jnp.dot(r_ref[...], x_ref[...], preferred_element_type=jnp.float32)
        # Column interpolation: per-channel full-size MXU matmuls on static,
        # 128-aligned lane slices of `mid` (no grid overhead, no tiny dims).
        for ch in range(c):
            sub = mid[:, ch * wi_p:(ch + 1) * wi_p].astype(jnp.bfloat16)
            o_ref[ch, :, :] = jnp.dot(sub, cm_ref[...],
                                      preferred_element_type=jnp.float32)
    return kernel


@functools.lru_cache(maxsize=128)
def _build_resize_fn(c: int, h_in: int, w_in: int, h_out: int, w_out: int):
    # Padded sizes: lane dims -> multiples of 128, sublane dims -> 16 (bf16).
    hi_p = _round_up(h_in, 16)
    wi_p = _round_up(w_in, 128)
    wo_p = _round_up(w_out, 128)

    # Tile the output-row axis into near-equal tiles of at most 256 rows
    # (keeps per-step VMEM bounded for v7x's 64 MiB while staying MXU-friendly).
    ho_16 = _round_up(h_out, 16)
    n_tiles = max(1, -(-ho_16 // 256))
    tile_ho = _round_up(-(-ho_16 // n_tiles), 16)
    ho_p = tile_ho * n_tiles

    # Interpolation matrices, built once on host; zero padding rows/cols make
    # the spatial padding inert.
    rmat_np = np.zeros((ho_p, hi_p), np.float32)
    rmat_np[:h_out, :h_in] = _bilinear_matrix(h_out, h_in)
    cmat_t_np = np.zeros((wi_p, wo_p), np.float32)
    cmat_t_np[:w_in, :w_out] = _bilinear_matrix(w_out, w_in).T

    kernel = _make_resize_kernel(c, wi_p)

    flops = 2 * ho_p * hi_p * c * wi_p + 2 * c * ho_p * wi_p * wo_p
    bytes_accessed = (hi_p * c * wi_p + ho_p * hi_p + wi_p * wo_p) * 2 \
        + c * ho_p * wo_p * 4

    resize_call = pl.pallas_call(
        kernel,
        grid=(n_tiles,),
        in_specs=[
            # whole (padded, transposed) image: VMEM-resident across tiles
            pl.BlockSpec((hi_p, c * wi_p), lambda i: (0, 0)),
            # row-interp rows belonging to this output-row tile
            pl.BlockSpec((tile_ho, hi_p), lambda i: (i, 0)),
            # transposed column-interp matrix: VMEM-resident across tiles
            pl.BlockSpec((wi_p, wo_p), lambda i: (0, 0)),
        ],
        out_specs=pl.BlockSpec((c, tile_ho, wo_p), lambda i: (0, i, 0)),
        out_shape=jax.ShapeDtypeStruct((c, ho_p, wo_p), jnp.float32),
        compiler_params=pltpu.CompilerParams(
            dimension_semantics=("parallel",),      # independent output-row tiles
            vmem_limit_bytes=48 * 1024 * 1024,      # stays under v7x 64 MiB VMEM
        ),
        cost_estimate=pl.CostEstimate(
            flops=int(flops), transcendentals=0,
            bytes_accessed=int(bytes_accessed)),
    )

    def fn(img):
        # Layout plumbing on the XLA side: pad spatial dims, move H onto the
        # sublane axis with channels folded into lanes, cast MXU operands bf16.
        x = img.astype(jnp.float32)
        x = jnp.pad(x, ((0, 0), (0, hi_p - h_in), (0, wi_p - w_in)))
        x = x.transpose(1, 0, 2).reshape(hi_p, c * wi_p).astype(jnp.bfloat16)
        r = jnp.asarray(rmat_np).astype(jnp.bfloat16)
        ct = jnp.asarray(cmat_t_np).astype(jnp.bfloat16)
        out = resize_call(x, r, ct)
        return out[:, :h_out, :w_out]

    return jax.jit(fn)


def bilinear_resize_chw(sample, h_out: int, w_out: int):
    """Bilinear resize of a (C, H, W) image to (C, h_out, w_out) via Pallas."""
    c, h_in, w_in = (int(d) for d in sample.shape)
    if (h_out, w_out) == (h_in, w_in):
        return sample  # bilinear resize to the same size is the identity
    # TODO(synk): every distinct (h_out, w_out) compiles one kernel variant; the
    # lru_cache bounds recompiles — bucket rescale_dims in production pipelines.
    return _build_resize_fn(c, h_in, w_in, int(h_out), int(w_out))(sample)


class RandomRescale:
    """Faithful port of the PyTorch RandomRescale forward pass."""

    def __init__(self, rescale_dims, max_rescale_dim, random_sample_max_iters=100):
        self.rescale_dims = list(rescale_dims)
        self.max_rescale_dim = max_rescale_dim
        self.random_sample_max_iters = random_sample_max_iters

    def __call__(self, sample):
        shape = list(sample.shape)                 # (C, H, W)
        image_height = shape[1]
        image_width = shape[2]
        # NOTE: reproduces the original module's quirk — these indices (0 or 1)
        # are used to index the FULL CHW shape below.
        larger_dim_idx = 0 if image_height > image_width else 1
        smaller_dim_idx = 0 if image_height < image_width else 1
        rescale_dims = [i for i in self.rescale_dims]
        rescaled_shape = None
        for _ in range(self.random_sample_max_iters):
            if len(rescale_dims) > 0:
                idx, smaller_dim = random.choice(list(enumerate(rescale_dims)))
                rescale_ratio = smaller_dim / shape[smaller_dim_idx]
                larger_dim = rescale_ratio * shape[larger_dim_idx]
                if larger_dim > self.max_rescale_dim:
                    rescale_dims.pop(idx)
                else:
                    rescaled_shape = list(shape)
                    rescaled_shape[larger_dim_idx] = int(larger_dim)
                    rescaled_shape[smaller_dim_idx] = int(smaller_dim)
                    break
            else:
                larger_dim = self.max_rescale_dim
                rescale_ratio = larger_dim / shape[larger_dim_idx]
                smaller_dim = rescale_ratio * shape[smaller_dim_idx]
                rescaled_shape = list(shape)
                rescaled_shape[larger_dim_idx] = int(larger_dim)
                rescaled_shape[smaller_dim_idx] = int(smaller_dim)
                break
        if rescaled_shape is not None:
            h_out, w_out = int(rescaled_shape[1]), int(rescaled_shape[2])
            return bilinear_resize_chw(sample, h_out, w_out)
        return sample


if __name__ == "__main__":
    random.seed(0)            # deterministic host-side sampling (as in the module)
    key = jax.random.PRNGKey(0)
    C, H, W = 3, 24, 16       # H > W: module rescales H to a chosen rescale_dim
    sample = jax.random.uniform(key, (C, H, W), dtype=jnp.float32)

    op = RandomRescale(rescale_dims=[8, 16, 32], max_rescale_dim=48)
    out = jax.block_until_ready(op(sample))
    h_out, w_out = out.shape[1], out.shape[2]

    # Reference: f32 bilinear with the same interpolation matrices.
    ref = np.einsum("oh,chw,pw->cop",
                    _bilinear_matrix(h_out, H),
                    np.asarray(sample, np.float32),
                    _bilinear_matrix(w_out, W))
    err = float(np.max(np.abs(np.asarray(out, np.float32) - ref)))
    assert out.shape == (C, h_out, w_out), out.shape
    assert err < 5e-2, f"max abs err {err}"

    # Also exercise a generic (H_out, W_out) resize directly through the kernel.
    out2 = jax.block_until_ready(bilinear_resize_chw(sample, 40, 20))
    ref2 = np.einsum("oh,chw,pw->cop",
                     _bilinear_matrix(40, H),
                     np.asarray(sample, np.float32),
                     _bilinear_matrix(20, W))
    err2 = float(np.max(np.abs(np.asarray(out2, np.float32) - ref2)))
    assert out2.shape == (C, 40, 20), out2.shape
    assert err2 < 5e-2, f"max abs err {err2}"

    print("KERNEL_OK")
</pallas_src>

<mosaic_0001>
module attributes {stable_mosaic.version = 11 : i64} {
  func.func @kernel(%arg0: i32, %arg1: memref<32x384xbf16, #tpu.memory_space<vmem>>, %arg2: memref<16x32xbf16, #tpu.memory_space<vmem>>, %arg3: memref<128x128xbf16, #tpu.memory_space<vmem>>, %arg4: memref<3x16x128xf32, #tpu.memory_space<vmem>>) attributes {dimension_semantics = [#tpu.dimension_semantics<parallel>], iteration_bounds = array<i64: 1>, scalar_prefetch = 0 : i64, scratch_operands = 0 : i64, tpu.core_type = #tpu.core_type<tc>, window_params = [{pipeline_mode = #tpu.pipeline_mode<synchronous>, transform_indices = @transform_0, window_bounds = array<i64: 32, 384>}, {transform_indices = @transform_1, window_bounds = array<i64: 16, 32>}, {pipeline_mode = #tpu.pipeline_mode<synchronous>, transform_indices = @transform_2, window_bounds = array<i64: 128, 128>}, {transform_indices = @transform_3, window_bounds = array<i64: 3, 16, 128>}]} {
    %c0 = arith.constant 0 : index
    %c0_0 = arith.constant 0 : index
    %0 = vector.load %arg2[%c0, %c0_0] : memref<16x32xbf16, #tpu.memory_space<vmem>>, vector<16x32xbf16>
    %c0_1 = arith.constant 0 : index
    %c0_2 = arith.constant 0 : index
    %1 = vector.load %arg1[%c0_1, %c0_2] : memref<32x384xbf16, #tpu.memory_space<vmem>>, vector<32x384xbf16>
    %cst = arith.constant dense<0.000000e+00> : vector<16x384xf32>
    %2 = tpu.matmul %0, %1, %cst {dimension_numbers = #tpu.dot_dimension_numbers<[1], [0], [0], [1], [0, 0, 1, 1], [], []>} : vector<16x32xbf16>, vector<32x384xbf16>, vector<16x384xf32> -> vector<16x384xf32>
    %3 = vector.extract_strided_slice %2 {offsets = [0, 0], sizes = [16, 128], strides = [1, 1]} : vector<16x384xf32> to vector<16x128xf32>
    %4 = arith.truncf %3 : vector<16x128xf32> to vector<16x128xbf16>
    %c0_3 = arith.constant 0 : index
    %c0_4 = arith.constant 0 : index
    %5 = vector.load %arg3[%c0_3, %c0_4] : memref<128x128xbf16, #tpu.memory_space<vmem>>, vector<128x128xbf16>
    %cst_5 = arith.constant dense<0.000000e+00> : vector<16x128xf32>
    %6 = tpu.matmul %4, %5, %cst_5 {dimension_numbers = #tpu.dot_dimension_numbers<[1], [0], [0], [1], [0, 0, 1, 1], [], []>} : vector<16x128xbf16>, vector<128x128xbf16>, vector<16x128xf32> -> vector<16x128xf32>
    %c0_6 = arith.constant 0 : index
    %c0_7 = arith.constant 0 : index
    %c0_8 = arith.constant 0 : index
    %7 = vector.load %arg4[%c0_6, %c0_7, %c0_8] : memref<3x16x128xf32, #tpu.memory_space<vmem>>, vector<1x16x128xf32>
    %8 = vector.shape_cast %7 : vector<1x16x128xf32> to vector<16x128xf32>
    %9 = vector.shape_cast %6 : vector<16x128xf32> to vector<1x16x128xf32>
    tpu.vector_store %arg4[%c0_6, %c0_7, %c0_8], %9 {strides = array<i32>} : memref<3x16x128xf32, #tpu.memory_space<vmem>>, vector<1x16x128xf32>,
    %10 = vector.extract_strided_slice %2 {offsets = [0, 128], sizes = [16, 128], strides = [1, 1]} : vector<16x384xf32> to vector<16x128xf32>
    %11 = arith.truncf %10 : vector<16x128xf32> to vector<16x128xbf16>
    %c0_9 = arith.constant 0 : index
    %c0_10 = arith.constant 0 : index
    %12 = vector.load %arg3[%c0_9, %c0_10] : memref<128x128xbf16, #tpu.memory_space<vmem>>, vector<128x128xbf16>
    %cst_11 = arith.constant dense<0.000000e+00> : vector<16x128xf32>
    %13 = tpu.matmul %11, %12, %cst_11 {dimension_numbers = #tpu.dot_dimension_numbers<[1], [0], [0], [1], [0, 0, 1, 1], [], []>} : vector<16x128xbf16>, vector<128x128xbf16>, vector<16x128xf32> -> vector<16x128xf32>
    %c1 = arith.constant 1 : index
    %c0_12 = arith.constant 0 : index
    %c0_13 = arith.constant 0 : index
    %14 = vector.load %arg4[%c1, %c0_12, %c0_13] : memref<3x16x128xf32, #tpu.memory_space<vmem>>, vector<1x16x128xf32>
    %15 = vector.shape_cast %14 : vector<1x16x128xf32> to vector<16x128xf32>
    %16 = vector.shape_cast %13 : vector<16x128xf32> to vector<1x16x128xf32>
    tpu.vector_store %arg4[%c1, %c0_12, %c0_13], %16 {strides = array<i32>} : memref<3x16x128xf32, #tpu.memory_space<vmem>>, vector<1x16x128xf32>,
    %17 = vector.extract_strided_slice %2 {offsets = [0, 256], sizes = [16, 128], strides = [1, 1]} : vector<16x384xf32> to vector<16x128xf32>
    %18 = arith.truncf %17 : vector<16x128xf32> to vector<16x128xbf16>
    %c0_14 = arith.constant 0 : index
    %c0_15 = arith.constant 0 : index
    %19 = vector.load %arg3[%c0_14, %c0_15] : memref<128x128xbf16, #tpu.memory_space<vmem>>, vector<128x128xbf16>
    %cst_16 = arith.constant dense<0.000000e+00> : vector<16x128xf32>
    %20 = tpu.matmul %18, %19, %cst_16 {dimension_numbers = #tpu.dot_dimension_numbers<[1], [0], [0], [1], [0, 0, 1, 1], [], []>} : vector<16x128xbf16>, vector<128x128xbf16>, vector<16x128xf32> -> vector<16x128xf32>
    %c2 = arith.constant 2 : index
    %c0_17 = arith.constant 0 : index
    %c0_18 = arith.constant 0 : index
    %21 = vector.load %arg4[%c2, %c0_17, %c0_18] : memref<3x16x128xf32, #tpu.memory_space<vmem>>, vector<1x16x128xf32>
    %22 = vector.shape_cast %21 : vector<1x16x128xf32> to vector<16x128xf32>
    %23 = vector.shape_cast %20 : vector<16x128xf32> to vector<1x16x128xf32>
    tpu.vector_store %arg4[%c2, %c0_17, %c0_18], %23 {strides = array<i32>} : memref<3x16x128xf32, #tpu.memory_space<vmem>>, vector<1x16x128xf32>,
    return
  }
  func.func @transform_0(%arg0: i32) -> (i32, i32) {
    %c0_i32 = arith.constant 0 : i32
    %c0_i32_0 = arith.constant 0 : i32
    %c0_i32_1 = arith.constant 0 : i32
    return %c0_i32, %c0_i32_0 : i32, i32
  }
  func.func @transform_1(%arg0: i32) -> (i32, i32) {
    %c0_i32 = arith.constant 0 : i32
    %c0_i32_0 = arith.constant 0 : i32
    return %arg0, %c0_i32 : i32, i32
  }
  func.func @transform_2(%arg0: i32) -> (i32, i32) {
    %c0_i32 = arith.constant 0 : i32
    %c0_i32_0 = arith.constant 0 : i32
    %c0_i32_1 = arith.constant 0 : i32
    return %c0_i32, %c0_i32_0 : i32, i32
  }
  func.func @transform_3(%arg0: i32) -> (i32, i32, i32) {
    %c0_i32 = arith.constant 0 : i32
    %c0_i32_0 = arith.constant 0 : i32
    %c0_i32_1 = arith.constant 0 : i32
    return %c0_i32, %arg0, %c0_i32_0 : i32, i32, i32
  }
}

</mosaic_0001>

<bundles_post_ra>
// kernel: fn.1
= control target key start
LH: loop header
LB: loop body
LE: loop exit
PB: predicated region body
PF: predicated region fallthrough
CT: control target
= control target key end

     0   :  { %v687_v2 = vmov 0   ;;  %v688_v4 = vmov 0.0   ;;  %vm689_vm0 = vmmov 0   ;;  %vm63_vm1 = vcmask 261120   ;;  %s854_s0 = inlined_call_operand.vmem [shape: bf16[32,384], index: 0, kind: input, shape index: {}]   ;;  %s855_s1 = inlined_call_operand.vmem [shape: bf16[16,32], index: 1, kind: input, shape index: {}]   ;;  %s856_s2 = inlined_call_operand.vmem [shape: bf16[128,128], index: 2, kind: input, shape index: {}]   ;;  %s857_s3 = inlined_call_operand.hbm [shape: f32[3,16,128], index: 3, kind: output, shape index: {}]  }
   0x1   :  { %v630_v0 = vld [vmem:[%s854_s0 + $0x4] ss:$12 sps:$4 sm:$0xff]   ;;  %v632_v1 = vld [vmem:[%s854_s0] ss:$12 sps:$4 sm:$0xff]   ;;  %99 = vmatprep.mubr.bf16.mxu1 %v687_v2  ;;  %v633_v3 = vld [vmem:[%s854_s0 + $0x1c] ss:$12 sps:$4 sm:$0xff]   ;;  %564 = vmatprep.subr.bf16.mxu0 %v688_v4 }
   0x2   :  { %67 = vmatprep.subr.bf16.mxu1 %v630_v0  ;;  %v635_v5 = vld [vmem:[%s854_s0 + $0x18] ss:$12 sps:$4 sm:$0xff]   ;;  %580 = vmatprep.mubr.msk.bf16.mxu0 %vm689_vm0, %v688_v4  ;;  %v637_v8 = vld [vmem:[%s854_s0 + $0x8] ss:$12 sps:$4 sm:$0xff]   ;;  %v638_v10 = vld [vmem:[%s854_s0 + $0x20] ss:$12 sps:$4 sm:$0xff]  }
   0x3   :  { %68 = vmatpush1.bf16.msra.mxu1 %v632_v1  ;;  %v636_v6 = vld [vmem:[%s855_s1] sm:$0xff]   ;;  %v641_v9 = vld [vmem:[%s856_s2 + $0x8] sm:$0xff]   ;;  %v643_v11 = vld [vmem:[%s856_s2 + $0x10] sm:$0xff]  }
   0x4   :  { %69 = vmatprep.subr.bf16.mxu1 %v633_v3  ;;  %v639_v7 = vld [vmem:[%s856_s2] sm:$0xff]   ;;  %v645_v13 = vld [vmem:[%s856_s2 + $0x18] sm:$0xff]   ;;  %v642_v14 = vld [vmem:[%s856_s2 + $0x8] sm:$0xff]  }
   0x5   :  { %565 = vmatpush3.bf16.msra.mxu0 %v639_v7  ;;  %v640_v12 = vld [vmem:[%s856_s2] sm:$0xff]   ;;  %v644_v16 = vld [vmem:[%s856_s2 + $0x10] sm:$0xff]   ;;  %v649_v17 = vld [vmem:[%s856_s2 + $0x28] sm:$0xff]  }
   0x6   :  { %566 = vmatprep.subr.bf16.mxu0 %v688_v4  ;;  %v647_v15 = vld [vmem:[%s856_s2 + $0x20] sm:$0xff]  }
   0x7   :  { %70 = vmatpush1.bf16.msra.mxu1 %v635_v5 }
   0x8   :  { %556 = vmatprep.subr.bf16.mxu1 %v688_v4 }
   0x9   :  { %567 = vmatpush3.bf16.msra.mxu0 %v641_v9 }
   0xa   :  { %500 = vmatmul.mubr.msk.bf16.vlgmr.msra.gmra.mrb[0].mxu1 %vm63_vm1, %v636_v6  ;;  %568 = vmatprep.subr.bf16.mxu0 %v688_v4 }
   0xb   :  { %557 = vmatpush3.bf16.msra.mxu1 %v637_v8  ;;  %560 = vmatprep.mubr.msk.bf16.mxu1 %vm689_vm0, %v688_v4 }
   0xc   :  { %558 = vmatprep.subr.bf16.mxu1 %v688_v4 }
   0xd   :  { %569 = vmatpush3.bf16.msra.mxu0 %v643_v11 }
   0xe   :  { %570 = vmatprep.subr.bf16.mxu0 %v688_v4 }
   0xf   :  { %559 = vmatpush3.bf16.msra.mxu1 %v638_v10 }
  0x10   :  { %584 = vmatprep.subr.bf16.mxu1 %v688_v4 }
  0x11   :  { %571 = vmatpush3.bf16.msra.mxu0 %v645_v13 }
  0x12   :  { %561 = vmatmul.mubr.msk.bf16.vlgmr.msra.gmra.mrb[4].mxu1 %vm63_vm1, %v636_v6  ;;  %572 = vmatprep.subr.bf16.mxu0 %v688_v4 }
  0x13   :  { %585 = vmatpush3.bf16.msra.mxu1 %v640_v12  ;;  %600 = vmatprep.mubr.msk.bf16.mxu1 %vm689_vm0, %v688_v4 }
  0x14   :  { %586 = vmatprep.subr.bf16.mxu1 %v688_v4 }
  0x15   :  { %573 = vmatpush3.bf16.msra.mxu0 %v647_v15 }
  0x16   :  { %574 = vmatprep.subr.bf16.mxu0 %v688_v4 }
  0x17   :  { %587 = vmatpush3.bf16.msra.mxu1 %v642_v14 }
  0x18   :  { %588 = vmatprep.subr.bf16.mxu1 %v688_v4 }
  0x19   :  { %8 = vsyncpa [#allocation3], 0  ;;  %v646_v18 = vld [vmem:[%s856_s2 + $0x18] sm:$0xff]   ;;  %575 = vmatpush3.bf16.msra.mxu0 %v649_v17  ;;  %v651_v19 = vld [vmem:[%s856_s2 + $0x30] sm:$0xff]   ;;  %s690_s16 = smov [#allocation2]  }
  0x1a   :  { %576 = vmatprep.subr.bf16.mxu0 %v688_v4  ;;  %v648_v20 = vld [vmem:[%s856_s2 + $0x20] sm:$0xff]   ;;  %v650_v21 = vld [vmem:[%s856_s2 + $0x28] sm:$0xff]   ;;  %v652_v22 = vld [vmem:[%s856_s2 + $0x30] sm:$0xff]   ;;  %s482_s17 = sshll.u32 %s690_s16, 4  ;;  %s483_s17 = int_to_ptr.vmem [resolvable:$true] %s482_s17 }
  0x1b   :  { %589 = vmatpush3.bf16.msra.mxu1 %v644_v16  ;;  %v653_v23 = vld [vmem:[%s856_s2 + $0x38] sm:$0xff]   ;;  %v655_v28 = vld [vmem:[%s856_s2] sm:$0xff]   ;;  %v656_v32 = vld [vmem:[%s856_s2 + $0x8] sm:$0xff]   ;;  %p668_p1 = scmp.lt.s32.totalorder %s483_s17, %s483_s17 }
  0x1c   :  { %590 = vmatprep.subr.bf16.mxu1 %v688_v4  ;;  %v654_v24 = vld [vmem:[%s856_s2 + $0x38] sm:$0xff]   ;;  %v657_v35 = vld [vmem:[%s856_s2 + $0x10] sm:$0xff]   ;;  %v659_v40 = vld [vmem:[%s856_s2 + $0x20] sm:$0xff]  }
  0x1d   :  { %577 = vmatpush3.bf16.msra.mxu0 %v651_v19  ;;  %v658_v39 = vld [vmem:[%s856_s2 + $0x18] sm:$0xff]   ;;  %v660_v41 = vld [vmem:[%s856_s2 + $0x28] sm:$0xff]   ;;  %v661_v42 = vld [vmem:[%s856_s2 + $0x30] sm:$0xff]  }
  0x1e   :  { %578 = vmatprep.subr.bf16.mxu0 %v688_v4  ;;  %v662_v43 = vld [vmem:[%s856_s2 + $0x38] sm:$0xff]   ;;  %s663_s2 = scalar_lea.vmem %s483_s17, 768 }
  0x1f   :  { %591 = vmatpush3.bf16.msra.mxu1 %v646_v18  ;;  %p664_p0 = scmp.ne.s32.totalorder %s483_s17, %s663_s2  ;;  %p669_p2 = scmp.lt.s32.totalorder %s663_s2, %s663_s2 }
  0x20   :  { %592 = vmatprep.subr.bf16.mxu1 %v688_v4 }
  0x21   :  { %579 = vmatpush3.bf16.msra.mxu0 %v653_v23  ;;  %p670_p3 = por %p669_p2, %p668_p1 }
  0x22   :  { %604 = vmatprep.subr.bf16.mxu0 %v688_v4 }
  0x23   :  { %593 = vmatpush3.bf16.msra.mxu1 %v648_v20  ;;  %p671_p4 = pnand %p670_p3, %p664_p0 }
  0x24   :  { %594 = vmatprep.subr.bf16.mxu1 %v688_v4 }
  0x27   :  { %595 = vmatpush3.bf16.msra.mxu1 %v650_v21 }
  0x28   :  { %596 = vmatprep.subr.bf16.mxu1 %v688_v4 }
  0x2b   :  { %597 = vmatpush3.bf16.msra.mxu1 %v652_v22 }
  0x2c   :  { %598 = vmatprep.subr.bf16.mxu1 %v688_v4 }
  0x2f   :  { %599 = vmatpush3.bf16.msra.mxu1 %v654_v24 }
  0xdd   :  { %v101_v25 = vpop.f32.mrb[0].mxu1 }
  0xde   :  { %v103_v26 = vpop.f32.mrb[1].mxu1 }
  0xdf   :  { %v105_v27 = vpop.f32.mrb[2].mxu1 }
  0xe0   :  { %v151_v29 = vpack.c.bf16 %v105_v27, %v101_v25  ;;  %v107_v30 = vpop.f32.mrb[3].mxu1 }
  0xe1   :  { %v259_v31 = vpack.c.bf16 %v107_v30, %v103_v26 }
  0xe2   :  { %581 = vmatmul.mubr.bf16.vlgmr.msra.gmra.mrb[0].mxu0 %v151_v29 }
  0xe3   :  { %605 = vmatpush3.bf16.msra.mxu0 %v655_v28  ;;  %601 = vmatmul.mubr.bf16.vlgmr.msra.gmra.mrb[8].mxu1 %v259_v31 }
  0xe4   :  { %606 = vmatprep.subr.bf16.mxu0 %v688_v4  ;;  %620 = vmatprep.mubr.msk.bf16.mxu0 %vm689_vm0, %v688_v4 }
  0xe5   :  { %v144_v33 = vpop.f32.mrb[4].mxu1 }
  0xe6   :  { %v562_v34 = vpop.f32.mrb[5].mxu1 }
  0xe7   :  { %607 = vmatpush3.bf16.msra.mxu0 %v656_v32  ;;  %v147_v36 = vpop.f32.mrb[6].mxu1 }
  0xe8   :  { %608 = vmatprep.subr.bf16.mxu0 %v688_v4  ;;  %v368_v37 = vpack.c.bf16 %v147_v36, %v144_v33  ;;  %v563_v38 = vpop.f32.mrb[7].mxu1 }
  0xeb   :  { %609 = vmatpush3.bf16.msra.mxu0 %v657_v35 }
  0xec   :  { %610 = vmatprep.subr.bf16.mxu0 %v688_v4 }
  0xef   :  { %611 = vmatpush3.bf16.msra.mxu0 %v658_v39 }
  0xf0   :  { %612 = vmatprep.subr.bf16.mxu0 %v688_v4 }
  0xf3   :  { %613 = vmatpush3.bf16.msra.mxu0 %v659_v40 }
  0xf4   :  { %614 = vmatprep.subr.bf16.mxu0 %v688_v4 }
  0xf7   :  { %615 = vmatpush3.bf16.msra.mxu0 %v660_v41 }
  0xf8   :  { %616 = vmatprep.subr.bf16.mxu0 %v688_v4 }
  0xfb   :  { %617 = vmatpush3.bf16.msra.mxu0 %v661_v42 }
  0xfc   :  { %618 = vmatprep.subr.bf16.mxu0 %v688_v4 }
  0xff   :  { %619 = vmatpush3.bf16.msra.mxu0 %v662_v43 }
 0x102   :  { %621 = vmatmul.mubr.bf16.vlgmr.msra.gmra.mrb[4].mxu0 %v368_v37 }
 0x1b5   :  { %v250_v44 = vpop.f32.mrb[0].mxu0 }
 0x1b6   :  { %257 = vst [vmem:[#allocation2] sm:$0xff] %v250_v44  ;;  %v582_v45 = vpop.f32.mrb[1].mxu0  ;;  %v358_v46 = vpop.f32.mrb[8].mxu1 }
 0x1b7   :  { %366 = vst [vmem:[#allocation2 + $0x10] sm:$0xff] %v358_v46  ;;  %v253_v47 = vpop.f32.mrb[2].mxu0  ;;  %v602_v48 = vpop.f32.mrb[9].mxu1 }
 0x1b8   :  { %258 = vst [vmem:[#allocation2 + $0x8] sm:$0xff] %v253_v47  ;;  %v583_v49 = vpop.f32.mrb[3].mxu0  ;;  %v361_v50 = vpop.f32.mrb[10].mxu1 }
 0x1b9   :  { %367 = vst [vmem:[#allocation2 + $0x18] sm:$0xff] %v361_v50  ;;  %v603_v51 = vpop.f32.mrb[11].mxu1 }
 0x1d5   :  { %v467_v52 = vpop.f32.mrb[4].mxu0 }
 0x1d6   :  { %475 = vst [vmem:[#allocation2 + $0x20] sm:$0xff] %v467_v52  ;;  %v622_v53 = vpop.f32.mrb[5].mxu0 }
 0x1d7   :  { %v470_v54 = vpop.f32.mrb[6].mxu0 }
 0x1d8   :  { %476 = vst [vmem:[#allocation2 + $0x28] sm:$0xff] %v470_v54  ;;  %v623_v55 = vpop.f32.mrb[7].mxu0 }
 0x1d9   :  { %674 = shalt.err (!%p671_p4)
}
 0x1da   :  { %s675_s20 = scalar_lea.hbm %s857_s3, 768 }
 0x1db   :  { %p676_p5 = scmp.ne.s32.totalorder %s857_s3, %s675_s20  ;;  %p679_p6 = scmp.lt.u32.totalorder %s675_s20, %s857_s3 }
 0x1dd   :  { %p681_p7 = pnand %p679_p6, %p676_p5 }
 0x1df   :  { %684 = shalt.err (!%p681_p7)
}
 0x1e0   :  { %s691_s25 = smov 128   ;;  %s692_s26 = smov 8  }
 0x1e1   :  { %488 = dma.vmem_to_hbm [thread:$0]  %s483_s17, 768, %s857_s3, [#allocation3], %s691_s25, %s691_s25, %s692_s26  }
 0x1e2   :  { %685 = dma.done.wait [#allocation3], 768  }
 0x1e3   :  { %686 = vsyncadd [#allocation3], 4294966528 }
 0x1e4   :  { %492 = vsyncpa [#allocation3], 1 }

</bundles_post_ra>
